<compile_context>
chip_gen: v7x
topology: tpu7x:2x2x1
jax: 0.10.0
libtpu: 0.0.40
codegen_flags: <defaults>
</compile_context>

<pallas_src>
import jax
import jax.numpy as jnp
from jax.experimental import pallas as pl
from jax.experimental.pallas import tpu as pltpu

LANE = 128  # TPU lane width: hidden / class dims are padded up to this.


def _round_up(x, m):
    return ((x + m - 1) // m) * m


def mlp_head_kernel(x_ref, w1_ref, b1_ref, w2_ref, b2_ref, w3_ref, b3_ref, o_ref):
    # Layer 1: bf16 x bf16 MXU matmul with f32 accumulation; bias+ReLU in f32.
    h1 = jnp.dot(x_ref[...], w1_ref[...], preferred_element_type=jnp.float32)
    h1 = jnp.maximum(h1 + b1_ref[...], 0.0)
    # Layer 2: feed activations to the MXU as bf16 (bf16-native on v6e/v7x).
    h2 = jnp.dot(h1.astype(jnp.bfloat16), w2_ref[...],
                 preferred_element_type=jnp.float32)
    h2 = jnp.maximum(h2 + b2_ref[...], 0.0)
    # Layer 3: logits (no activation). Lane-dense (tm, 128) store.
    out = jnp.dot(h2.astype(jnp.bfloat16), w3_ref[...],
                  preferred_element_type=jnp.float32)
    o_ref[...] = (out + b3_ref[...]).astype(o_ref.dtype)


def init_params(key, input_dim, num_classes):
    """Deterministic init matching nn.Linear shapes (stored transposed: (in, out))."""
    hidden = input_dim // 2
    keys = jax.random.split(key, 6)

    def linear(kw, kb, fan_in, fan_out):
        bound = 1.0 / jnp.sqrt(fan_in)
        w = jax.random.uniform(kw, (fan_in, fan_out), jnp.float32, -bound, bound)
        b = jax.random.uniform(kb, (1, fan_out), jnp.float32, -bound, bound)
        return w, b

    w1, b1 = linear(keys[0], keys[1], input_dim, hidden)
    w2, b2 = linear(keys[2], keys[3], hidden, hidden)
    w3, b3 = linear(keys[4], keys[5], hidden, num_classes)
    return dict(w1=w1, b1=b1, w2=w2, b2=b2, w3=w3, b3=b3)


def prepare_params(p):
    """Zero-pad hidden/class dims to 128 lanes; cast weights to bf16 (biases f32)."""
    D, H = p["w1"].shape
    C = p["w3"].shape[1]
    Hp = _round_up(H, LANE)
    Cp = _round_up(C, LANE)

    def pad2(a, shape):
        out = jnp.zeros(shape, a.dtype)
        return out.at[: a.shape[0], : a.shape[1]].set(a)

    return dict(
        w1=pad2(p["w1"], (D, Hp)).astype(jnp.bfloat16),
        b1=pad2(p["b1"], (1, Hp)),                    # f32 (padded lanes are 0)
        w2=pad2(p["w2"], (Hp, Hp)).astype(jnp.bfloat16),
        b2=pad2(p["b2"], (1, Hp)),
        w3=pad2(p["w3"], (Hp, Cp)).astype(jnp.bfloat16),
        b3=pad2(p["b3"], (1, Cp)),
    )


def head_forward(x, padded_params, num_classes, *, tm=512):
    """x: (B, D) float32. padded_params: output of prepare_params. Returns (B, C) f32."""
    B, D = x.shape
    Hp = padded_params["w1"].shape[1]
    Cp = padded_params["w3"].shape[1]

    # Batch tile: 128-aligned (MXU pass friendly on all generations; default 512
    # is also a multiple of 256 for v6e/v7x). Shrink for small batches, and pad
    # the batch up to a multiple of the tile (ragged-tail handling).
    tm = _round_up(max(tm, LANE), LANE)
    tm_eff = min(tm, _round_up(B, LANE))
    B_pad = _round_up(B, tm_eff)

    x_bf16 = x.astype(jnp.bfloat16)
    if B_pad != B:
        x_bf16 = jnp.pad(x_bf16, ((0, B_pad - B), (0, 0)))

    grid = (B_pad // tm_eff,)
    # Weights / biases: constant block index -> resident across all grid steps.
    full = lambda shape: pl.BlockSpec(shape, lambda i: (0, 0))

    out_padded = pl.pallas_call(
        mlp_head_kernel,
        out_shape=jax.ShapeDtypeStruct((B_pad, Cp), jnp.float32),
        grid_spec=pltpu.PrefetchScalarGridSpec(
            num_scalar_prefetch=0,
            grid=grid,
            in_specs=[
                pl.BlockSpec((tm_eff, D), lambda i: (i, 0)),   # x tile (bf16)
                full((D, Hp)),                                 # w1 (bf16)
                full((1, Hp)),                                 # b1 (f32)
                full((Hp, Hp)),                                # w2 (bf16)
                full((1, Hp)),                                 # b2 (f32)
                full((Hp, Cp)),                                # w3 (bf16)
                full((1, Cp)),                                 # b3 (f32)
            ],
            out_specs=pl.BlockSpec((tm_eff, Cp), lambda i: (i, 0)),  # lane-dense
        ),
        compiler_params=pltpu.CompilerParams(
            dimension_semantics=("parallel",),      # megacore-shardable batch axis
            vmem_limit_bytes=32 * 1024 * 1024,      # headroom for large tm; safe on v5e/v6e/v7x
        ),
    )(x_bf16, padded_params["w1"], padded_params["b1"],
      padded_params["w2"], padded_params["b2"],
      padded_params["w3"], padded_params["b3"])

    # Strip batch padding and the lane padding of the class dimension.
    return out_padded[:B, :num_classes]


def head_reference_f32(x, p):
    """Pure-JAX f32 reference (mirrors the PyTorch forward exactly)."""
    h = jnp.maximum(x @ p["w1"] + p["b1"], 0.0)
    h = jnp.maximum(h @ p["w2"] + p["b2"], 0.0)
    return h @ p["w3"] + p["b3"]


def head_reference_bf16(x, pp, num_classes):
    """Reference that mirrors the kernel's bf16 input / f32 accumulation exactly."""
    f32 = lambda a: a.astype(jnp.float32)
    xb = f32(x.astype(jnp.bfloat16))
    h = jnp.maximum(xb @ f32(pp["w1"]) + pp["b1"], 0.0)
    h = jnp.maximum(f32(h.astype(jnp.bfloat16)) @ f32(pp["w2"]) + pp["b2"], 0.0)
    out = f32(h.astype(jnp.bfloat16)) @ f32(pp["w3"]) + pp["b3"]
    return out[:, :num_classes]


if __name__ == "__main__":
    # Small, module-consistent shapes: batch=8, input_dim=64 (-> hidden 32), classes=10
    B, D, C = 8, 64, 10
    key = jax.random.PRNGKey(0)
    kx, kp, kx2 = jax.random.split(key, 3)

    x = jax.random.normal(kx, (B, D), jnp.float32)
    params = init_params(kp, D, C)
    pp = prepare_params(params)

    out = jax.block_until_ready(head_forward(x, pp, C))
    assert out.shape == (B, C), f"bad output shape {out.shape}"

    # Exact-semantics check against a reference doing identical bf16 rounding.
    ref_bf16 = head_reference_bf16(x, pp, C)
    assert jnp.allclose(out, ref_bf16, atol=1e-4, rtol=1e-4), "mismatch vs bf16 reference"
    # Loose check against the full-f32 PyTorch-equivalent forward.
    ref_f32 = head_reference_f32(x, params)
    assert jnp.allclose(out, ref_f32, atol=3e-2, rtol=3e-2), "mismatch vs f32 reference"

    # Ragged-batch / multi-step-grid path (exercises padding + 2-step grid).
    B2 = 300
    x2 = jax.random.normal(kx2, (B2, D), jnp.float32)
    out2 = jax.block_until_ready(head_forward(x2, pp, C, tm=256))
    assert out2.shape == (B2, C), f"bad output shape {out2.shape}"
    ref2 = head_reference_bf16(x2, pp, C)
    assert jnp.allclose(out2, ref2, atol=1e-4, rtol=1e-4), "mismatch on ragged batch"

    print("KERNEL_OK")
</pallas_src>

<mosaic_0001>
module attributes {stable_mosaic.version = 11 : i64} {
  func.func @mlp_head_kernel(%arg0: i32, %arg1: memref<128x64xbf16, #tpu.memory_space<vmem>>, %arg2: memref<64x128xbf16, #tpu.memory_space<vmem>>, %arg3: memref<1x128xf32, #tpu.memory_space<vmem>>, %arg4: memref<128x128xbf16, #tpu.memory_space<vmem>>, %arg5: memref<1x128xf32, #tpu.memory_space<vmem>>, %arg6: memref<128x128xbf16, #tpu.memory_space<vmem>>, %arg7: memref<1x128xf32, #tpu.memory_space<vmem>>, %arg8: memref<128x128xf32, #tpu.memory_space<vmem>>) attributes {dimension_semantics = [#tpu.dimension_semantics<parallel>], iteration_bounds = array<i64: 1>, scalar_prefetch = 0 : i64, scratch_operands = 0 : i64, tpu.core_type = #tpu.core_type<tc>, window_params = [{transform_indices = @transform_0, window_bounds = array<i64: 128, 64>}, {pipeline_mode = #tpu.pipeline_mode<synchronous>, transform_indices = @transform_1, window_bounds = array<i64: 64, 128>}, {pipeline_mode = #tpu.pipeline_mode<synchronous>, transform_indices = @transform_2, window_bounds = array<i64: 1, 128>}, {pipeline_mode = #tpu.pipeline_mode<synchronous>, transform_indices = @transform_3, window_bounds = array<i64: 128, 128>}, {pipeline_mode = #tpu.pipeline_mode<synchronous>, transform_indices = @transform_4, window_bounds = array<i64: 1, 128>}, {pipeline_mode = #tpu.pipeline_mode<synchronous>, transform_indices = @transform_5, window_bounds = array<i64: 128, 128>}, {pipeline_mode = #tpu.pipeline_mode<synchronous>, transform_indices = @transform_6, window_bounds = array<i64: 1, 128>}, {transform_indices = @transform_7, window_bounds = array<i64: 128, 128>}]} {
    %c0 = arith.constant 0 : index
    %c0_0 = arith.constant 0 : index
    %0 = vector.load %arg1[%c0, %c0_0] : memref<128x64xbf16, #tpu.memory_space<vmem>>, vector<128x64xbf16>
    %c0_1 = arith.constant 0 : index
    %c0_2 = arith.constant 0 : index
    %1 = vector.load %arg2[%c0_1, %c0_2] : memref<64x128xbf16, #tpu.memory_space<vmem>>, vector<64x128xbf16>
    %cst = arith.constant dense<0.000000e+00> : vector<128x128xf32>
    %2 = tpu.matmul %0, %1, %cst {dimension_numbers = #tpu.dot_dimension_numbers<[1], [0], [0], [1], [0, 0, 1, 1], [], []>} : vector<128x64xbf16>, vector<64x128xbf16>, vector<128x128xf32> -> vector<128x128xf32>
    %c0_3 = arith.constant 0 : index
    %c0_4 = arith.constant 0 : index
    %3 = vector.load %arg3[%c0_3, %c0_4] : memref<1x128xf32, #tpu.memory_space<vmem>>, vector<1x128xf32>
    %4 = vector.broadcast %3 : vector<1x128xf32> to vector<128x128xf32>
    %5 = arith.addf %2, %4 : vector<128x128xf32>
    %cst_5 = arith.constant 0.000000e+00 : f32
    %6 = vector.broadcast %cst_5 : f32 to vector<128x128xf32>
    %7 = arith.maximumf %5, %6 : vector<128x128xf32>
    %8 = arith.truncf %7 : vector<128x128xf32> to vector<128x128xbf16>
    %c0_6 = arith.constant 0 : index
    %c0_7 = arith.constant 0 : index
    %9 = vector.load %arg4[%c0_6, %c0_7] : memref<128x128xbf16, #tpu.memory_space<vmem>>, vector<128x128xbf16>
    %cst_8 = arith.constant dense<0.000000e+00> : vector<128x128xf32>
    %10 = tpu.matmul %8, %9, %cst_8 {dimension_numbers = #tpu.dot_dimension_numbers<[1], [0], [0], [1], [0, 0, 1, 1], [], []>} : vector<128x128xbf16>, vector<128x128xbf16>, vector<128x128xf32> -> vector<128x128xf32>
    %c0_9 = arith.constant 0 : index
    %c0_10 = arith.constant 0 : index
    %11 = vector.load %arg5[%c0_9, %c0_10] : memref<1x128xf32, #tpu.memory_space<vmem>>, vector<1x128xf32>
    %12 = vector.broadcast %11 : vector<1x128xf32> to vector<128x128xf32>
    %13 = arith.addf %10, %12 : vector<128x128xf32>
    %cst_11 = arith.constant 0.000000e+00 : f32
    %14 = vector.broadcast %cst_11 : f32 to vector<128x128xf32>
    %15 = arith.maximumf %13, %14 : vector<128x128xf32>
    %16 = arith.truncf %15 : vector<128x128xf32> to vector<128x128xbf16>
    %c0_12 = arith.constant 0 : index
    %c0_13 = arith.constant 0 : index
    %17 = vector.load %arg6[%c0_12, %c0_13] : memref<128x128xbf16, #tpu.memory_space<vmem>>, vector<128x128xbf16>
    %cst_14 = arith.constant dense<0.000000e+00> : vector<128x128xf32>
    %18 = tpu.matmul %16, %17, %cst_14 {dimension_numbers = #tpu.dot_dimension_numbers<[1], [0], [0], [1], [0, 0, 1, 1], [], []>} : vector<128x128xbf16>, vector<128x128xbf16>, vector<128x128xf32> -> vector<128x128xf32>
    %c0_15 = arith.constant 0 : index
    %c0_16 = arith.constant 0 : index
    %19 = vector.load %arg7[%c0_15, %c0_16] : memref<1x128xf32, #tpu.memory_space<vmem>>, vector<1x128xf32>
    %20 = vector.broadcast %19 : vector<1x128xf32> to vector<128x128xf32>
    %21 = arith.addf %18, %20 : vector<128x128xf32>
    %c0_17 = arith.constant 0 : index
    %c0_18 = arith.constant 0 : index
    %22 = vector.load %arg8[%c0_17, %c0_18] : memref<128x128xf32, #tpu.memory_space<vmem>>, vector<128x128xf32>
    tpu.vector_store %arg8[%c0_17, %c0_18], %21 {strides = array<i32>} : memref<128x128xf32, #tpu.memory_space<vmem>>, vector<128x128xf32>,
    return
  }
  func.func @transform_0(%arg0: i32) -> (i32, i32) {
    %c0_i32 = arith.constant 0 : i32
    %c0_i32_0 = arith.constant 0 : i32
    return %arg0, %c0_i32 : i32, i32
  }
  func.func @transform_1(%arg0: i32) -> (i32, i32) {
    %c0_i32 = arith.constant 0 : i32
    %c0_i32_0 = arith.constant 0 : i32
    %c0_i32_1 = arith.constant 0 : i32
    return %c0_i32, %c0_i32_0 : i32, i32
  }
  func.func @transform_2(%arg0: i32) -> (i32, i32) {
    %c0_i32 = arith.constant 0 : i32
    %c0_i32_0 = arith.constant 0 : i32
    %c0_i32_1 = arith.constant 0 : i32
    return %c0_i32, %c0_i32_0 : i32, i32
  }
  func.func @transform_3(%arg0: i32) -> (i32, i32) {
    %c0_i32 = arith.constant 0 : i32
    %c0_i32_0 = arith.constant 0 : i32
    %c0_i32_1 = arith.constant 0 : i32
    return %c0_i32, %c0_i32_0 : i32, i32
  }
  func.func @transform_4(%arg0: i32) -> (i32, i32) {
    %c0_i32 = arith.constant 0 : i32
    %c0_i32_0 = arith.constant 0 : i32
    %c0_i32_1 = arith.constant 0 : i32
    return %c0_i32, %c0_i32_0 : i32, i32
  }
  func.func @transform_5(%arg0: i32) -> (i32, i32) {
    %c0_i32 = arith.constant 0 : i32
    %c0_i32_0 = arith.constant 0 : i32
    %c0_i32_1 = arith.constant 0 : i32
    return %c0_i32, %c0_i32_0 : i32, i32
  }
  func.func @transform_6(%arg0: i32) -> (i32, i32) {
    %c0_i32 = arith.constant 0 : i32
    %c0_i32_0 = arith.constant 0 : i32
    %c0_i32_1 = arith.constant 0 : i32
    return %c0_i32, %c0_i32_0 : i32, i32
  }
  func.func @transform_7(%arg0: i32) -> (i32, i32) {
    %c0_i32 = arith.constant 0 : i32
    %c0_i32_0 = arith.constant 0 : i32
    return %arg0, %c0_i32 : i32, i32
  }
}

</mosaic_0001>

<bundles_post_ra>
// kernel: tpu_custom_call.1
= control target key start
LH: loop header
LB: loop body
LE: loop exit
PB: predicated region body
PF: predicated region fallthrough
CT: control target
= control target key end

     0   :  { %12 = vsyncpa [#allocation3], 0  ;;  %s1128_s0 = inlined_call_operand.vmem [shape: bf16[128,64], index: 0, kind: input, shape index: {}]   ;;  %s1129_s1 = inlined_call_operand.vmem [shape: bf16[64,128], index: 1, kind: input, shape index: {}]   ;;  %s1130_s2 = inlined_call_operand.vmem [shape: f32[1,128], index: 2, kind: input, shape index: {}]   ;;  %s1131_s3 = inlined_call_operand.vmem [shape: bf16[128,128], index: 3, kind: input, shape index: {}]   ;;  %s1132_s4 = inlined_call_operand.vmem [shape: f32[1,128], index: 4, kind: input, shape index: {}]   ;;  %s1133_s5 = inlined_call_operand.hbm [shape: bf16[128,128], index: 5, kind: input, shape index: {}]   ;;  %s1134_s6 = inlined_call_operand.vmem [shape: f32[1,128], index: 6, kind: input, shape index: {}]   ;;  %s1135_s7 = inlined_call_operand.hbm [shape: f32[128,128], index: 7, kind: output, shape index: {}]  }
   0x1   :  { %13 = vsyncpa [#allocation4], 0  ;;  %s945_s24 = smov [#allocation2]   ;;  %s897_s28 = scalar_lea.hbm %s1133_s5, 1024 }
   0x2   :  { %s29_s25 = sshll.u32 %s945_s24, 4  ;;  %p898_p0 = scmp.ne.s32.totalorder %s1133_s5, %s897_s28  ;;  %s30_s25 = int_to_ptr.vmem [resolvable:$true] %s29_s25 }
   0x3   :  { %p901_p1 = scmp.lt.u32.totalorder %s897_s28, %s1133_s5 }
   0x5   :  { %p903_p2 = pnand %p901_p1, %p898_p0 }
   0x7   :  { %906 = shalt.err (!%p903_p2)
}
   0x8   :  { %s907_s10 = scalar_lea.vmem %s30_s25, 1024  ;;  %p912_p4 = scmp.lt.s32.totalorder %s30_s25, %s30_s25 }
   0x9   :  { %p908_p3 = scmp.ne.s32.totalorder %s30_s25, %s907_s10  ;;  %p913_p5 = scmp.lt.s32.totalorder %s907_s10, %s907_s10 }
   0xb   :  { %p914_p6 = por %p913_p5, %p912_p4 }
   0xd   :  { %p915_p7 = pnand %p914_p6, %p908_p3 }
   0xf   :  { %918 = shalt.err (!%p915_p7)
}
  0x10   :  { %s946_s11 = smov 64   ;;  %s947_s12 = smov 4  }
  0x11   :  { %35 = dma.hbm_to_vmem [thread:$0]  %s1133_s5, 1024, %s30_s25, [#allocation3], %s946_s11, %s946_s11, %s947_s12  }
  0x12   :  { %941 = dma.done.wait [#allocation3], 1024  }
  0x13   :  { %942 = vsyncadd [#allocation3], 4294966272  ;;  %v869_v0 = vld [vmem:[%s1129_s1] sm:$0xff]   ;;  %v870_v1 = vld [vmem:[%s1129_s1 + $0x8] sm:$0xff]   ;;  %vm137_vm0 = vcmask 523264  }
  0x14   :  { %759 = vmatprep.subr.bf16.mxu0 %v869_v0  ;;  %v871_v2 = vld [vmem:[%s1129_s1 + $0x10] sm:$0xff]   ;;  %v873_v3 = vld [vmem:[%s1128_s0] sm:$0xff]   ;;  %v872_v4 = vld [vmem:[%s1129_s1 + $0x18] sm:$0xff]  }
  0x15   :  { %760 = vmatpush3.bf16.msra.mxu0 %v869_v0  ;;  %767 = vmatprep.mubr.msk.bf16.mxu0 %vm137_vm0, %v873_v3  ;;  %v881_v5 = vld [vmem:[%s1131_s3] sm:$0xff]   ;;  %v882_v6 = vld [vmem:[%s1131_s3 + $0x8] sm:$0xff]   ;;  %v875_v8 = vld [vmem:[%s1128_s0 + $0x10] sm:$0xff]  }
  0x16   :  { %761 = vmatprep.subr.bf16.mxu0 %v870_v1  ;;  %v874_v7 = vld [vmem:[%s1128_s0 + $0x8] sm:$0xff]   ;;  %783 = vmatprep.subr.bf16.mxu1 %v881_v5  ;;  %v883_v9 = vld [vmem:[%s1131_s3 + $0x10] sm:$0xff]   ;;  %v884_v10 = vld [vmem:[%s1131_s3 + $0x18] sm:$0xff]  }
  0x17   :  { %784 = vmatpush3.bf16.msra.mxu1 %v881_v5  ;;  %v876_v11 = vld [vmem:[%s1128_s0 + $0x18] sm:$0xff]   ;;  %v877_v12 = vld [vmem:[%s1128_s0 + $0x20] sm:$0xff]   ;;  %v886_v14 = vld [vmem:[%s1131_s3 + $0x28] sm:$0xff]  }
  0x18   :  { %785 = vmatprep.subr.bf16.mxu1 %v882_v6  ;;  %v885_v13 = vld [vmem:[%s1131_s3 + $0x20] sm:$0xff]   ;;  %v878_v15 = vld [vmem:[%s1128_s0 + $0x28] sm:$0xff]   ;;  %v879_v16 = vld [vmem:[%s1128_s0 + $0x30] sm:$0xff]  }
  0x19   :  { %762 = vmatpush3.bf16.msra.mxu0 %v870_v1  ;;  %v880_v17 = vld [vmem:[%s1128_s0 + $0x38] sm:$0xff]   ;;  %v887_v18 = vld [vmem:[%s1131_s3 + $0x30] sm:$0xff]   ;;  %v889_v20 = vld [vmem:[#allocation2] sm:$0xff]  }
  0x1a   :  { %763 = vmatprep.subr.bf16.mxu0 %v871_v2  ;;  %v888_v19 = vld [vmem:[%s1131_s3 + $0x38] sm:$0xff]   ;;  %v890_v21 = vld [vmem:[#allocation2 + $0x8] sm:$0xff]   ;;  %v891_v22 = vld [vmem:[#allocation2 + $0x10] sm:$0xff]  }
  0x1b   :  { %786 = vmatpush3.bf16.msra.mxu1 %v882_v6  ;;  %v1071_v23 = vld [vmem:[#allocation2 + $0x18] sm:$0xff]   ;;  %v1074_v24 = vld [vmem:[#allocation2 + $0x20] sm:$0xff]   ;;  %v1078_v25 = vld [vmem:[#allocation2 + $0x28] sm:$0xff]  }
  0x1c   :  { %787 = vmatprep.subr.bf16.mxu1 %v883_v9  ;;  %v1086_v26 = vld [vmem:[%s1130_s2] ss:$0 sm:$0xff] }
  0x1d   :  { %764 = vmatpush3.bf16.msra.mxu0 %v871_v2 }
  0x1e   :  { %765 = vmatprep.subr.bf16.mxu0 %v872_v4 }
  0x1f   :  { %788 = vmatpush3.bf16.msra.mxu1 %v883_v9 }
  0x20   :  { %789 = vmatprep.subr.bf16.mxu1 %v884_v10 }
  0x21   :  { %766 = vmatpush3.bf16.msra.mxu0 %v872_v4 }
  0x22   :  { %815 = vmatprep.subr.bf16.mxu0 %v889_v20 }
  0x23   :  { %790 = vmatpush3.bf16.msra.mxu1 %v884_v10 }
  0x24   :  { %768 = vmatmul.mubr.msk.bf16.vlgmr.msra.gmra.mrb[0].mxu0 %vm137_vm0, %v874_v7  ;;  %791 = vmatprep.subr.bf16.mxu1 %v885_v13 }
  0x25   :  { %771 = vmatprep.mubr.msk.bf16.mxu0 %vm137_vm0, %v875_v8  ;;  %816 = vmatpush3.bf16.msra.mxu0 %v889_v20 }
  0x26   :  { %817 = vmatprep.subr.bf16.mxu0 %v890_v21 }
  0x27   :  { %792 = vmatpush3.bf16.msra.mxu1 %v885_v13 }
  0x28   :  { %793 = vmatprep.subr.bf16.mxu1 %v886_v14 }
  0x29   :  { %818 = vmatpush3.bf16.msra.mxu0 %v890_v21 }
  0x2a   :  { %819 = vmatprep.subr.bf16.mxu0 %v891_v22 }
  0x2b   :  { %794 = vmatpush3.bf16.msra.mxu1 %v886_v14 }
  0x2c   :  { %772 = vmatmul.mubr.msk.bf16.gmra.mrb[4].mxu0 %vm137_vm0, %v876_v11  ;;  %795 = vmatprep.subr.bf16.mxu1 %v887_v18 }
  0x2d   :  { %775 = vmatprep.mubr.msk.bf16.mxu0 %vm137_vm0, %v877_v12  ;;  %820 = vmatpush3.bf16.msra.mxu0 %v891_v22 }
  0x2e   :  { %821 = vmatprep.subr.bf16.mxu0 %v1071_v23 }
  0x2f   :  { %796 = vmatpush3.bf16.msra.mxu1 %v887_v18 }
  0x30   :  { %797 = vmatprep.subr.bf16.mxu1 %v888_v19 }
  0x31   :  { %822 = vmatpush3.bf16.msra.mxu0 %v1071_v23 }
  0x32   :  { %823 = vmatprep.subr.bf16.mxu0 %v1074_v24 }
  0x33   :  { %798 = vmatpush3.bf16.msra.mxu1 %v888_v19  ;;  %v895_v19 = vld [vmem:[#allocation2 + $0x30] sm:$0xff]  }
  0x34   :  { %776 = vmatmul.mubr.msk.bf16.gmra.mrb[8].mxu0 %vm137_vm0, %v878_v15  ;;  %847 = vmatprep.subr.bf16.mxu1 %v889_v20 }
  0x35   :  { %779 = vmatprep.mubr.msk.bf16.mxu0 %vm137_vm0, %v879_v16  ;;  %824 = vmatpush3.bf16.msra.mxu0 %v1074_v24 }
  0x36   :  { %825 = vmatprep.subr.bf16.mxu0 %v1078_v25 }
  0x39   :  { %826 = vmatpush3.bf16.msra.mxu0 %v1078_v25 }
  0x3a   :  { %827 = vmatprep.subr.bf16.mxu0 %v895_v19 }
  0x3c   :  { %780 = vmatmul.mubr.msk.bf16.gmra.mrb[12].mxu0 %vm137_vm0, %v880_v17 }
  0x3d   :  { %828 = vmatpush3.bf16.msra.mxu0 %v895_v19 }
  0xf7   :  { %v769_v27 = vpop.f32.mrb[0].mxu0 }
  0xf8   :  { %v205_v28 = vadd.f32 %v769_v27, %v1086_v26  ;;  %v196_v29 = vpop.f32.mrb[1].mxu0 }
  0xf9   :  { %v197_v30 = vadd.f32 %v1086_v26, %v196_v29  ;;  %v770_v31 = vpop.f32.mrb[2].mxu0 }
  0xfa   :  { %v208_v32 = vadd.f32 %v770_v31, %v1086_v26  ;;  %v199_v33 = vpop.f32.mrb[3].mxu0  ;;  %v261_v35 = vmax.f32 %v205_v28, 0.0 }
  0xfb   :  { %v200_v34 = vadd.f32 %v1086_v26, %v199_v33  ;;  %v259_v37 = vmax.f32 %v197_v30, 0.0 }
  0xfc   :  { %v262_v36 = vmax.f32 %v208_v32, 0.0 }
  0xfd   :  { %v260_v38 = vmax.f32 %v200_v34, 0.0 }
  0xfe   :  { %v276_v39 = vpack.c.bf16 %v262_v36, %v261_v35 }
  0xff   :  { %v773_v40 = vpop.f32.mrb[4].mxu0  ;;  %v275_v41 = vpack.c.bf16 %v260_v38, %v259_v37 }
 0x100   :  { %v221_v42 = vadd.f32 %v773_v40, %v1086_v26  ;;  %v212_v43 = vpop.f32.mrb[5].mxu0 }
 0x101   :  { %v213_v44 = vadd.f32 %v1086_v26, %v212_v43  ;;  %v774_v45 = vpop.f32.mrb[6].mxu0  ;;  %799 = vmatprep.mubr.bf16.mxu1 %v275_v41 }
 0x102   :  { %v224_v46 = vadd.f32 %v774_v45, %v1086_v26  ;;  %v215_v47 = vpop.f32.mrb[7].mxu0  ;;  %800 = vmatmul.mubr.bf16.vlgmr.msra.gmra.mrb[0].mxu1 %v276_v39  ;;  %v265_v49 = vmax.f32 %v221_v42, 0.0 }
 0x103   :  { %v216_v48 = vadd.f32 %v1086_v26, %v215_v47  ;;  %855 = vmatpush3.bf16.msra.mxu1 %v889_v20  ;;  %v263_v51 = vmax.f32 %v213_v44, 0.0  ;;  %v896_v20 = vld [vmem:[#allocation2 + $0x38] sm:$0xff]  }
 0x104   :  { %v266_v50 = vmax.f32 %v224_v46, 0.0  ;;  %848 = vmatprep.subr.bf16.mxu1 %v890_v21  ;;  %829 = vmatprep.subr.bf16.mxu0 %v896_v20 }
 0x105   :  { %v264_v52 = vmax.f32 %v216_v48, 0.0  ;;  %830 = vmatpush3.bf16.msra.mxu0 %v896_v20 }
 0x106   :  { %v278_v53 = vpack.c.bf16 %v266_v50, %v265_v49 }
 0x107   :  { %v277_v54 = vpack.c.bf16 %v264_v52, %v263_v51  ;;  %v777_v55 = vpop.f32.mrb[8].mxu0  ;;  %856 = vmatpush3.bf16.msra.mxu1 %v890_v21  ;;  %v697_v21 = vld [vmem:[%s1132_s4] ss:$0 sm:$0xff] }
 0x108   :  { %v237_v56 = vadd.f32 %v777_v55, %v1086_v26  ;;  %v228_v57 = vpop.f32.mrb[9].mxu0  ;;  %849 = vmatprep.subr.bf16.mxu1 %v891_v22 }
 0x109   :  { %v229_v58 = vadd.f32 %v1086_v26, %v228_v57  ;;  %v778_v59 = vpop.f32.mrb[10].mxu0  ;;  %803 = vmatprep.mubr.bf16.mxu1 %v277_v54 }
 0x10a   :  { %v240_v60 = vadd.f32 %v778_v59, %v1086_v26  ;;  %v231_v61 = vpop.f32.mrb[11].mxu0  ;;  %804 = vmatmul.mubr.bf16.gmra.mrb[4].mxu1 %v278_v53  ;;  %v269_v63 = vmax.f32 %v237_v56, 0.0 }
 0x10b   :  { %v232_v62 = vadd.f32 %v1086_v26, %v231_v61  ;;  %857 = vmatpush3.bf16.msra.mxu1 %v891_v22  ;;  %v267_v1 = vmax.f32 %v229_v58, 0.0 }
 0x10c   :  { %v270_v0 = vmax.f32 %v240_v60, 0.0  ;;  %850 = vmatprep.subr.bf16.mxu1 %v1071_v23 }
 0x10d   :  { %v268_v2 = vmax.f32 %v232_v62, 0.0 }
 0x10e   :  { %v280_v3 = vpack.c.bf16 %v270_v0, %v269_v63 }
 0x10f   :  { %v279_v4 = vpack.c.bf16 %v268_v2, %v267_v1  ;;  %v781_v5 = vpop.f32.mrb[12].mxu0  ;;  %858 = vmatpush3.bf16.msra.mxu1 %v1071_v23 }
 0x110   :  { %v253_v6 = vadd.f32 %v781_v5, %v1086_v26  ;;  %v244_v7 = vpop.f32.mrb[13].mxu0  ;;  %851 = vmatprep.subr.bf16.mxu1 %v1074_v24 }
 0x111   :  { %v245_v8 = vadd.f32 %v1086_v26, %v244_v7  ;;  %v782_v9 = vpop.f32.mrb[14].mxu0  ;;  %807 = vmatprep.mubr.bf16.mxu1 %v279_v4 }
 0x112   :  { %v256_v10 = vadd.f32 %v782_v9, %v1086_v26  ;;  %v247_v11 = vpop.f32.mrb[15].mxu0  ;;  %808 = vmatmul.mubr.bf16.gmra.mrb[8].mxu1 %v280_v3  ;;  %v273_v13 = vmax.f32 %v253_v6, 0.0 }
 0x113   :  { %v248_v12 = vadd.f32 %v1086_v26, %v247_v11  ;;  %859 = vmatpush3.bf16.msra.mxu1 %v1074_v24  ;;  %v271_v15 = vmax.f32 %v245_v8, 0.0 }
 0x114   :  { %v274_v14 = vmax.f32 %v256_v10, 0.0  ;;  %852 = vmatprep.subr.bf16.mxu1 %v1078_v25 }
 0x115   :  { %v272_v16 = vmax.f32 %v248_v12, 0.0 }
 0x116   :  { %v282_v17 = vpack.c.bf16 %v274_v14, %v273_v13  ;;  %v706_v14 = vld [vmem:[%s1134_s6] ss:$0 sm:$0xff]  ;;  %s948_s6 = smov [#allocation5]  }
 0x117   :  { %v281_v18 = vpack.c.bf16 %v272_v16, %v271_v15  ;;  %860 = vmatpush3.bf16.msra.mxu1 %v1078_v25  ;;  %s664_s8 = sshll.u32 %s948_s6, 4  ;;  %s665_s8 = int_to_ptr.vmem [resolvable:$true] %s664_s8 }
 0x118   :  { %853 = vmatprep.subr.bf16.mxu1 %v895_v19  ;;  %s919_s1 = scalar_lea.vmem %s665_s8, 2048  ;;  %p924_p9 = scmp.lt.s32.totalorder %s665_s8, %s665_s8 }
 0x119   :  { %811 = vmatprep.mubr.bf16.mxu1 %v281_v18  ;;  %p920_p8 = scmp.ne.s32.totalorder %s665_s8, %s919_s1  ;;  %p925_p10 = scmp.lt.s32.totalorder %s919_s1, %s919_s1 }
 0x11a   :  { %812 = vmatmul.mubr.bf16.gmra.mrb[12].mxu1 %v282_v17 }
 0x11b   :  { %861 = vmatpush3.bf16.msra.mxu1 %v895_v19  ;;  %p926_p11 = por %p925_p10, %p924_p9 }
 0x11c   :  { %854 = vmatprep.subr.bf16.mxu1 %v896_v20 }
 0x11d   :  { %p927_p12 = pnand %p926_p11, %p920_p8 }
 0x11f   :  { %862 = vmatpush3.bf16.msra.mxu1 %v896_v20 }
 0x1d5   :  { %v801_v22 = vpop.f32.mrb[0].mxu1 }
 0x1d6   :  { %v397_v23 = vadd.f32 %v801_v22, %v697_v21  ;;  %v388_v24 = vpop.f32.mrb[1].mxu1 }
 0x1d7   :  { %v389_v25 = vadd.f32 %v697_v21, %v388_v24  ;;  %v802_v26 = vpop.f32.mrb[2].mxu1 }
 0x1d8   :  { %v400_v27 = vadd.f32 %v802_v26, %v697_v21  ;;  %v391_v28 = vpop.f32.mrb[3].mxu1  ;;  %v453_v30 = vmax.f32 %v397_v23, 0.0 }
 0x1d9   :  { %v392_v29 = vadd.f32 %v697_v21, %v391_v28  ;;  %v451_v32 = vmax.f32 %v389_v25, 0.0 }
 0x1da   :  { %v454_v31 = vmax.f32 %v400_v27, 0.0 }
 0x1db   :  { %v452_v33 = vmax.f32 %v392_v29, 0.0 }
 0x1dc   :  { %v468_v34 = vpack.c.bf16 %v454_v31, %v453_v30 }
 0x1dd   :  { %v467_v35 = vpack.c.bf16 %v452_v33, %v451_v32  ;;  %v805_v36 = vpop.f32.mrb[4].mxu1 }
 0x1de   :  { %v413_v37 = vadd.f32 %v805_v36, %v697_v21  ;;  %v404_v38 = vpop.f32.mrb[5].mxu1 }
 0x1df   :  { %v405_v39 = vadd.f32 %v697_v21, %v404_v38  ;;  %v806_v40 = vpop.f32.mrb[6].mxu1  ;;  %831 = vmatprep.mubr.bf16.mxu0 %v467_v35 }
 0x1e0   :  { %v416_v41 = vadd.f32 %v806_v40, %v697_v21  ;;  %v407_v42 = vpop.f32.mrb[7].mxu1  ;;  %832 = vmatmul.mubr.bf16.vlgmr.msra.gmra.mrb[16].mxu0 %v468_v34  ;;  %v457_v44 = vmax.f32 %v413_v37, 0.0 }
 0x1e1   :  { %v408_v43 = vadd.f32 %v697_v21, %v407_v42  ;;  %v455_v46 = vmax.f32 %v405_v39, 0.0 }
 0x1e2   :  { %v458_v45 = vmax.f32 %v416_v41, 0.0 }
 0x1e3   :  { %v456_v47 = vmax.f32 %v408_v43, 0.0 }
 0x1e4   :  { %v470_v48 = vpack.c.bf16 %v458_v45, %v457_v44 }
 0x1e5   :  { %v469_v49 = vpack.c.bf16 %v456_v47, %v455_v46  ;;  %v809_v50 = vpop.f32.mrb[8].mxu1 }
 0x1e6   :  { %v429_v51 = vadd.f32 %v809_v50, %v697_v21  ;;  %v420_v52 = vpop.f32.mrb[9].mxu1 }
 0x1e7   :  { %v421_v53 = vadd.f32 %v697_v21, %v420_v52  ;;  %v810_v54 = vpop.f32.mrb[10].mxu1  ;;  %835 = vmatprep.mubr.bf16.mxu0 %v469_v49 }
 0x1e8   :  { %v432_v55 = vadd.f32 %v810_v54, %v697_v21  ;;  %v423_v56 = vpop.f32.mrb[11].mxu1  ;;  %836 = vmatmul.mubr.bf16.gmra.mrb[20].mxu0 %v470_v48  ;;  %v461_v58 = vmax.f32 %v429_v51, 0.0 }
 0x1e9   :  { %v424_v57 = vadd.f32 %v697_v21, %v423_v56  ;;  %v459_v60 = vmax.f32 %v421_v53, 0.0 }
 0x1ea   :  { %v462_v59 = vmax.f32 %v432_v55, 0.0 }
 0x1eb   :  { %v460_v61 = vmax.f32 %v424_v57, 0.0 }
 0x1ec   :  { %v472_v62 = vpack.c.bf16 %v462_v59, %v461_v58 }
 0x1ed   :  { %v471_v63 = vpack.c.bf16 %v460_v61, %v459_v60  ;;  %v813_v0 = vpop.f32.mrb[12].mxu1 }
 0x1ee   :  { %v445_v1 = vadd.f32 %v813_v0, %v697_v21  ;;  %v436_v2 = vpop.f32.mrb[13].mxu1 }
 0x1ef   :  { %v437_v3 = vadd.f32 %v697_v21, %v436_v2  ;;  %v814_v4 = vpop.f32.mrb[14].mxu1  ;;  %839 = vmatprep.mubr.bf16.mxu0 %v471_v63 }
 0x1f0   :  { %v448_v5 = vadd.f32 %v814_v4, %v697_v21  ;;  %v439_v6 = vpop.f32.mrb[15].mxu1  ;;  %840 = vmatmul.mubr.bf16.gmra.mrb[24].mxu0 %v472_v62  ;;  %v465_v8 = vmax.f32 %v445_v1, 0.0 }
 0x1f1   :  { %v440_v7 = vadd.f32 %v697_v21, %v439_v6  ;;  %v463_v10 = vmax.f32 %v437_v3, 0.0 }
 0x1f2   :  { %v466_v9 = vmax.f32 %v448_v5, 0.0 }
 0x1f3   :  { %v464_v11 = vmax.f32 %v440_v7, 0.0 }
 0x1f4   :  { %v474_v12 = vpack.c.bf16 %v466_v9, %v465_v8 }
 0x1f5   :  { %v473_v13 = vpack.c.bf16 %v464_v11, %v463_v10 }
 0x1f7   :  { %843 = vmatprep.mubr.bf16.mxu1 %v473_v13 }
 0x1f8   :  { %844 = vmatmul.mubr.bf16.vlgmr.msra.gmra.mrb[16].mxu1 %v474_v12 }
 0x2b3   :  { %v833_v15 = vpop.f32.mrb[16].mxu0 }
 0x2b4   :  { %v589_v16 = vadd.f32 %v833_v15, %v706_v14  ;;  %v580_v17 = vpop.f32.mrb[17].mxu0 }
 0x2b5   :  { %v581_v18 = vadd.f32 %v706_v14, %v580_v17  ;;  %v834_v19 = vpop.f32.mrb[18].mxu0 }
 0x2b6   :  { %645 = vst [vmem:[#allocation5 + $0x10] sm:$0xff] %v589_v16  ;;  %v592_v20 = vadd.f32 %v834_v19, %v706_v14  ;;  %v583_v21 = vpop.f32.mrb[19].mxu0 }
 0x2b7   :  { %643 = vst [vmem:[#allocation5] sm:$0xff] %v581_v18  ;;  %v584_v22 = vadd.f32 %v706_v14, %v583_v21 }
 0x2b8   :  { %646 = vst [vmem:[#allocation5 + $0x18] sm:$0xff] %v592_v20 }
 0x2b9   :  { %644 = vst [vmem:[#allocation5 + $0x8] sm:$0xff] %v584_v22 }
 0x2bb   :  { %v837_v23 = vpop.f32.mrb[20].mxu0 }
 0x2bc   :  { %v605_v24 = vadd.f32 %v837_v23, %v706_v14  ;;  %v596_v25 = vpop.f32.mrb[21].mxu0 }
 0x2bd   :  { %v597_v26 = vadd.f32 %v706_v14, %v596_v25  ;;  %v838_v27 = vpop.f32.mrb[22].mxu0 }
 0x2be   :  { %649 = vst [vmem:[#allocation5 + $0x30] sm:$0xff] %v605_v24  ;;  %v608_v28 = vadd.f32 %v838_v27, %v706_v14  ;;  %v599_v29 = vpop.f32.mrb[23].mxu0 }
 0x2bf   :  { %647 = vst [vmem:[#allocation5 + $0x20] sm:$0xff] %v597_v26  ;;  %v600_v30 = vadd.f32 %v706_v14, %v599_v29 }
 0x2c0   :  { %650 = vst [vmem:[#allocation5 + $0x38] sm:$0xff] %v608_v28 }
 0x2c1   :  { %648 = vst [vmem:[#allocation5 + $0x28] sm:$0xff] %v600_v30 }
 0x2c3   :  { %v841_v31 = vpop.f32.mrb[24].mxu0 }
 0x2c4   :  { %v621_v32 = vadd.f32 %v841_v31, %v706_v14  ;;  %v612_v33 = vpop.f32.mrb[25].mxu0 }
 0x2c5   :  { %v613_v34 = vadd.f32 %v706_v14, %v612_v33  ;;  %v842_v35 = vpop.f32.mrb[26].mxu0 }
 0x2c6   :  { %653 = vst [vmem:[#allocation5 + $0x50] sm:$0xff] %v621_v32  ;;  %v624_v36 = vadd.f32 %v842_v35, %v706_v14  ;;  %v615_v37 = vpop.f32.mrb[27].mxu0 }
 0x2c7   :  { %651 = vst [vmem:[#allocation5 + $0x40] sm:$0xff] %v613_v34  ;;  %v616_v38 = vadd.f32 %v706_v14, %v615_v37 }
 0x2c8   :  { %654 = vst [vmem:[#allocation5 + $0x58] sm:$0xff] %v624_v36 }
 0x2c9   :  { %652 = vst [vmem:[#allocation5 + $0x48] sm:$0xff] %v616_v38 }
 0x2cb   :  { %v845_v39 = vpop.f32.mrb[16].mxu1 }
 0x2cc   :  { %v637_v40 = vadd.f32 %v845_v39, %v706_v14  ;;  %v628_v41 = vpop.f32.mrb[17].mxu1 }
 0x2cd   :  { %v629_v42 = vadd.f32 %v706_v14, %v628_v41  ;;  %v846_v43 = vpop.f32.mrb[18].mxu1 }
 0x2ce   :  { %657 = vst [vmem:[#allocation5 + $0x70] sm:$0xff] %v637_v40  ;;  %v640_v44 = vadd.f32 %v846_v43, %v706_v14  ;;  %v631_v45 = vpop.f32.mrb[19].mxu1 }
 0x2cf   :  { %655 = vst [vmem:[#allocation5 + $0x60] sm:$0xff] %v629_v42  ;;  %v632_v46 = vadd.f32 %v706_v14, %v631_v45 }
 0x2d0   :  { %658 = vst [vmem:[#allocation5 + $0x78] sm:$0xff] %v640_v44 }
 0x2d1   :  { %656 = vst [vmem:[#allocation5 + $0x68] sm:$0xff] %v632_v46 }
 0x2d2   :  { %930 = shalt.err (!%p927_p12)
}
 0x2d3   :  { %s931_s11 = scalar_lea.hbm %s1135_s7, 2048 }
 0x2d4   :  { %p932_p13 = scmp.ne.s32.totalorder %s1135_s7, %s931_s11  ;;  %p935_p0 = scmp.lt.u32.totalorder %s931_s11, %s1135_s7 }
 0x2d6   :  { %p937_p1 = pnand %p935_p0, %p932_p13 }
 0x2d8   :  { %940 = shalt.err (!%p937_p1)
}
 0x2d9   :  { %s949_s16 = smov 128   ;;  %s950_s17 = smov 8  }
 0x2da   :  { %670 = dma.vmem_to_hbm [thread:$0]  %s665_s8, 2048, %s1135_s7, [#allocation4], %s949_s16, %s949_s16, %s950_s17  }
 0x2db   :  { %943 = dma.done.wait [#allocation4], 2048  }
 0x2dc   :  { %944 = vsyncadd [#allocation4], 4294965248 }
 0x2dd   :  { %674 = vsyncpa [#allocation3], 1 }
 0x2de   :  { %675 = vsyncpa [#allocation4], 1 }

</bundles_post_ra>
